<compile_context>
chip_gen: v6e
topology: v6e:2x2x1
jax: 0.10.0
libtpu: 0.0.40
codegen_flags: <defaults>
</compile_context>

<pallas_src>
import jax
import jax.numpy as jnp
from jax.experimental import pallas as pl
from jax.experimental.pallas import tpu as pltpu

_LANE = 128
_SUBLANE = 8
_HIDDEN = 256


def _round_up(x, m):
    return (x + m - 1) // m * m


def _actor_kernel(ma_ref, s_ref, w1_ref, b1_ref, w2_ref, b2_ref, w3_ref, b3_ref,
                  o_ref):
    # layer1: Linear(state_dim_pad, 256) + ReLU  (bf16 MXU matmul, f32 accumulate)
    h = jnp.dot(s_ref[...].astype(jnp.bfloat16), w1_ref[...],
                preferred_element_type=jnp.float32)
    h = jnp.maximum(h + b1_ref[...], 0.0)
    # layer2: Linear(256, 256) + ReLU
    h = jnp.dot(h.astype(jnp.bfloat16), w2_ref[...],
                preferred_element_type=jnp.float32)
    h = jnp.maximum(h + b2_ref[...], 0.0)
    # layer3: Linear(256, action_dim_pad) -> tanh -> * max_action
    h = jnp.dot(h.astype(jnp.bfloat16), w3_ref[...],
                preferred_element_type=jnp.float32)
    o_ref[...] = (jnp.tanh(h + b3_ref[...]) * ma_ref[0, 0]).astype(o_ref.dtype)


def actor_forward(state, prepared, max_action, *, block_b=1024):
    """state: (B, state_dim) f32. prepared: output of prepare_actor_params."""
    B, state_dim = state.shape
    action_dim = prepared["action_dim"]
    k_pad = prepared["w1"].shape[0]      # state_dim padded to a lane multiple (128)
    hidden = prepared["w1"].shape[1]     # 256
    n_pad = prepared["w3"].shape[1]      # action_dim padded to a lane multiple (128)

    # Batch tile: big enough to hit the HBM roofline, small enough for v7x's
    # 64 MiB VMEM (TB=1024 -> ~5 MiB of tiles + temporaries + 0.3 MiB weights).
    tb = max(_SUBLANE, min(block_b, _round_up(B, _SUBLANE)))
    b_pad = _round_up(B, tb)
    grid = (b_pad // tb,)

    # Zero-pad state once: batch -> multiple of tb, features -> k_pad.
    state_p = jnp.zeros((b_pad, k_pad), jnp.float32).at[:B, :state_dim].set(state)

    ma = jnp.full((1, 1), max_action, dtype=jnp.float32)

    flops = 2 * b_pad * (k_pad * hidden + hidden * hidden + hidden * n_pad)
    bytes_accessed = (
        state_p.size * 4
        + prepared["w1"].size * 2 + prepared["w2"].size * 2 + prepared["w3"].size * 2
        + prepared["b1"].size * 4 + prepared["b2"].size * 4 + prepared["b3"].size * 4
        + b_pad * n_pad * 4)
    cost = pl.CostEstimate(flops=flops,
                           transcendentals=b_pad * n_pad,
                           bytes_accessed=bytes_accessed)

    out = pl.pallas_call(
        _actor_kernel,
        out_shape=jax.ShapeDtypeStruct((b_pad, n_pad), jnp.float32),
        grid=grid,
        in_specs=[
            # max_action scalar in SMEM (whole array, no blocking)
            pl.BlockSpec(memory_space=pltpu.MemorySpace.SMEM),
            # streamed state tile
            pl.BlockSpec((tb, k_pad), lambda i: (i, 0)),
            # resident weights / biases (constant block index across the grid)
            pl.BlockSpec((k_pad, hidden), lambda i: (0, 0)),
            pl.BlockSpec((1, hidden), lambda i: (0, 0)),
            pl.BlockSpec((hidden, hidden), lambda i: (0, 0)),
            pl.BlockSpec((1, hidden), lambda i: (0, 0)),
            pl.BlockSpec((hidden, n_pad), lambda i: (0, 0)),
            pl.BlockSpec((1, n_pad), lambda i: (0, 0)),
        ],
        out_specs=pl.BlockSpec((tb, n_pad), lambda i: (i, 0)),
        compiler_params=pltpu.CompilerParams(
            dimension_semantics=("parallel",)),
        cost_estimate=cost,
    )(ma, state_p,
      prepared["w1"], prepared["b1"],
      prepared["w2"], prepared["b2"],
      prepared["w3"], prepared["b3"])

    return out[:B, :action_dim]


def init_actor_params(key, state_dim, action_dim, hidden=_HIDDEN):
    """Deterministic synthetic init (mimics PyTorch's uniform fan_in scaling).

    Weights are stored as (in_features, out_features) = nn.Linear weight^T.
    """
    keys = jax.random.split(key, 6)

    def linear(kw, kb, fan_in, fan_out):
        bound = 1.0 / jnp.sqrt(float(fan_in))
        w = jax.random.uniform(kw, (fan_in, fan_out), jnp.float32, -bound, bound)
        b = jax.random.uniform(kb, (1, fan_out), jnp.float32, -bound, bound)
        return w, b

    w1, b1 = linear(keys[0], keys[1], state_dim, hidden)
    w2, b2 = linear(keys[2], keys[3], hidden, hidden)
    w3, b3 = linear(keys[4], keys[5], hidden, action_dim)
    return {"w1": w1, "b1": b1, "w2": w2, "b2": b2, "w3": w3, "b3": b3}


def prepare_actor_params(raw):
    """One-time host-side prep: pad K/output dims to 128 lanes, cast weights bf16."""
    state_dim, hidden = raw["w1"].shape
    action_dim = raw["w3"].shape[1]
    k_pad = _round_up(max(state_dim, 1), _LANE)
    n_pad = _round_up(max(action_dim, 1), _LANE)

    w1 = (jnp.zeros((k_pad, hidden), jnp.float32)
          .at[:state_dim, :].set(raw["w1"]).astype(jnp.bfloat16))
    w2 = raw["w2"].astype(jnp.bfloat16)
    w3 = (jnp.zeros((hidden, n_pad), jnp.float32)
          .at[:, :action_dim].set(raw["w3"]).astype(jnp.bfloat16))
    b3 = jnp.zeros((1, n_pad), jnp.float32).at[:, :action_dim].set(raw["b3"])

    return {"w1": w1, "b1": raw["b1"],
            "w2": w2, "b2": raw["b2"],
            "w3": w3, "b3": b3,
            "action_dim": action_dim}


def actor_reference(state, raw, max_action):
    """Plain-JAX reference mirroring the kernel's bf16-matmul / f32-accumulate path."""
    def mm(x, w):
        return jnp.dot(x.astype(jnp.bfloat16), w.astype(jnp.bfloat16),
                       preferred_element_type=jnp.float32)

    h = jnp.maximum(mm(state, raw["w1"]) + raw["b1"], 0.0)
    h = jnp.maximum(mm(h, raw["w2"]) + raw["b2"], 0.0)
    return jnp.tanh(mm(h, raw["w3"]) + raw["b3"]) * max_action


if __name__ == "__main__":
    key = jax.random.PRNGKey(0)
    k_state, k_params = jax.random.split(key)

    batch = 2
    state_dim = 16
    action_dim = 4
    max_action = 1.0

    state = jax.random.normal(k_state, (batch, state_dim), jnp.float32)
    raw_params = init_actor_params(k_params, state_dim, action_dim)
    prepared = prepare_actor_params(raw_params)

    out = actor_forward(state, prepared, max_action)
    out = jax.block_until_ready(out)

    ref = actor_reference(state, raw_params, max_action)
    assert out.shape == (batch, action_dim)
    assert jnp.allclose(out, ref, atol=5e-3, rtol=5e-3), "mismatch vs reference"

    print("KERNEL_OK")
</pallas_src>

<mosaic_0001>
module attributes {stable_mosaic.version = 11 : i64} {
  func.func @_actor_kernel(%arg0: i32, %arg1: memref<1x1xf32, #tpu.memory_space<smem>>, %arg2: memref<8x128xf32, #tpu.memory_space<vmem>>, %arg3: memref<128x256xbf16, #tpu.memory_space<vmem>>, %arg4: memref<1x256xf32, #tpu.memory_space<vmem>>, %arg5: memref<256x256xbf16, #tpu.memory_space<vmem>>, %arg6: memref<1x256xf32, #tpu.memory_space<vmem>>, %arg7: memref<256x128xbf16, #tpu.memory_space<vmem>>, %arg8: memref<1x128xf32, #tpu.memory_space<vmem>>, %arg9: memref<8x128xf32, #tpu.memory_space<vmem>>) attributes {dimension_semantics = [#tpu.dimension_semantics<parallel>], iteration_bounds = array<i64: 1>, scalar_prefetch = 0 : i64, scratch_operands = 0 : i64, tpu.core_type = #tpu.core_type<tc>, window_params = [{transform_indices = @transform_0, window_bounds = array<i64: 1, 1>}, {transform_indices = @transform_1, window_bounds = array<i64: 8, 128>}, {pipeline_mode = #tpu.pipeline_mode<synchronous>, transform_indices = @transform_2, window_bounds = array<i64: 128, 256>}, {pipeline_mode = #tpu.pipeline_mode<synchronous>, transform_indices = @transform_3, window_bounds = array<i64: 1, 256>}, {pipeline_mode = #tpu.pipeline_mode<synchronous>, transform_indices = @transform_4, window_bounds = array<i64: 256, 256>}, {pipeline_mode = #tpu.pipeline_mode<synchronous>, transform_indices = @transform_5, window_bounds = array<i64: 1, 256>}, {pipeline_mode = #tpu.pipeline_mode<synchronous>, transform_indices = @transform_6, window_bounds = array<i64: 256, 128>}, {pipeline_mode = #tpu.pipeline_mode<synchronous>, transform_indices = @transform_7, window_bounds = array<i64: 1, 128>}, {transform_indices = @transform_8, window_bounds = array<i64: 8, 128>}]} {
    %c0 = arith.constant 0 : index
    %c0_0 = arith.constant 0 : index
    %0 = vector.load %arg2[%c0, %c0_0] : memref<8x128xf32, #tpu.memory_space<vmem>>, vector<8x128xf32>
    %1 = arith.truncf %0 : vector<8x128xf32> to vector<8x128xbf16>
    %c0_1 = arith.constant 0 : index
    %c0_2 = arith.constant 0 : index
    %2 = vector.load %arg3[%c0_1, %c0_2] : memref<128x256xbf16, #tpu.memory_space<vmem>>, vector<128x256xbf16>
    %cst = arith.constant dense<0.000000e+00> : vector<8x256xf32>
    %3 = tpu.matmul %1, %2, %cst {dimension_numbers = #tpu.dot_dimension_numbers<[1], [0], [0], [1], [0, 0, 1, 1], [], []>} : vector<8x128xbf16>, vector<128x256xbf16>, vector<8x256xf32> -> vector<8x256xf32>
    %c0_3 = arith.constant 0 : index
    %c0_4 = arith.constant 0 : index
    %4 = vector.load %arg4[%c0_3, %c0_4] : memref<1x256xf32, #tpu.memory_space<vmem>>, vector<1x256xf32>
    %5 = vector.broadcast %4 : vector<1x256xf32> to vector<8x256xf32>
    %6 = arith.addf %3, %5 : vector<8x256xf32>
    %cst_5 = arith.constant 0.000000e+00 : f32
    %7 = vector.broadcast %cst_5 : f32 to vector<8x256xf32>
    %8 = arith.maximumf %6, %7 : vector<8x256xf32>
    %9 = arith.truncf %8 : vector<8x256xf32> to vector<8x256xbf16>
    %c0_6 = arith.constant 0 : index
    %c0_7 = arith.constant 0 : index
    %10 = vector.load %arg5[%c0_6, %c0_7] : memref<256x256xbf16, #tpu.memory_space<vmem>>, vector<256x256xbf16>
    %cst_8 = arith.constant dense<0.000000e+00> : vector<8x256xf32>
    %11 = tpu.matmul %9, %10, %cst_8 {dimension_numbers = #tpu.dot_dimension_numbers<[1], [0], [0], [1], [0, 0, 1, 1], [], []>} : vector<8x256xbf16>, vector<256x256xbf16>, vector<8x256xf32> -> vector<8x256xf32>
    %c0_9 = arith.constant 0 : index
    %c0_10 = arith.constant 0 : index
    %12 = vector.load %arg6[%c0_9, %c0_10] : memref<1x256xf32, #tpu.memory_space<vmem>>, vector<1x256xf32>
    %13 = vector.broadcast %12 : vector<1x256xf32> to vector<8x256xf32>
    %14 = arith.addf %11, %13 : vector<8x256xf32>
    %cst_11 = arith.constant 0.000000e+00 : f32
    %15 = vector.broadcast %cst_11 : f32 to vector<8x256xf32>
    %16 = arith.maximumf %14, %15 : vector<8x256xf32>
    %17 = arith.truncf %16 : vector<8x256xf32> to vector<8x256xbf16>
    %c0_12 = arith.constant 0 : index
    %c0_13 = arith.constant 0 : index
    %18 = vector.load %arg7[%c0_12, %c0_13] : memref<256x128xbf16, #tpu.memory_space<vmem>>, vector<256x128xbf16>
    %cst_14 = arith.constant dense<0.000000e+00> : vector<8x128xf32>
    %19 = tpu.matmul %17, %18, %cst_14 {dimension_numbers = #tpu.dot_dimension_numbers<[1], [0], [0], [1], [0, 0, 1, 1], [], []>} : vector<8x256xbf16>, vector<256x128xbf16>, vector<8x128xf32> -> vector<8x128xf32>
    %c0_15 = arith.constant 0 : index
    %c0_16 = arith.constant 0 : index
    %20 = vector.load %arg8[%c0_15, %c0_16] : memref<1x128xf32, #tpu.memory_space<vmem>>, vector<1x128xf32>
    %21 = vector.broadcast %20 : vector<1x128xf32> to vector<8x128xf32>
    %22 = arith.addf %19, %21 : vector<8x128xf32>
    %23 = math.tanh %22 : vector<8x128xf32>
    %c0_17 = arith.constant 0 : index
    %c0_18 = arith.constant 0 : index
    %24 = memref.load %arg1[%c0_17, %c0_18] : memref<1x1xf32, #tpu.memory_space<smem>>
    %25 = vector.broadcast %24 : f32 to vector<8x128xf32>
    %26 = arith.mulf %23, %25 : vector<8x128xf32>
    %c0_19 = arith.constant 0 : index
    %c0_20 = arith.constant 0 : index
    %27 = vector.load %arg9[%c0_19, %c0_20] : memref<8x128xf32, #tpu.memory_space<vmem>>, vector<8x128xf32>
    tpu.vector_store %arg9[%c0_19, %c0_20], %26 {strides = array<i32>} : memref<8x128xf32, #tpu.memory_space<vmem>>, vector<8x128xf32>,
    return
  }
  func.func @transform_0(%arg0: i32) -> (i32, i32) {
    %c0_i32 = arith.constant 0 : i32
    %c0_i32_0 = arith.constant 0 : i32
    %c0_i32_1 = arith.constant 0 : i32
    return %c0_i32, %c0_i32_0 : i32, i32
  }
  func.func @transform_1(%arg0: i32) -> (i32, i32) {
    %c0_i32 = arith.constant 0 : i32
    %c0_i32_0 = arith.constant 0 : i32
    return %arg0, %c0_i32 : i32, i32
  }
  func.func @transform_2(%arg0: i32) -> (i32, i32) {
    %c0_i32 = arith.constant 0 : i32
    %c0_i32_0 = arith.constant 0 : i32
    %c0_i32_1 = arith.constant 0 : i32
    return %c0_i32, %c0_i32_0 : i32, i32
  }
  func.func @transform_3(%arg0: i32) -> (i32, i32) {
    %c0_i32 = arith.constant 0 : i32
    %c0_i32_0 = arith.constant 0 : i32
    %c0_i32_1 = arith.constant 0 : i32
    return %c0_i32, %c0_i32_0 : i32, i32
  }
  func.func @transform_4(%arg0: i32) -> (i32, i32) {
    %c0_i32 = arith.constant 0 : i32
    %c0_i32_0 = arith.constant 0 : i32
    %c0_i32_1 = arith.constant 0 : i32
    return %c0_i32, %c0_i32_0 : i32, i32
  }
  func.func @transform_5(%arg0: i32) -> (i32, i32) {
    %c0_i32 = arith.constant 0 : i32
    %c0_i32_0 = arith.constant 0 : i32
    %c0_i32_1 = arith.constant 0 : i32
    return %c0_i32, %c0_i32_0 : i32, i32
  }
  func.func @transform_6(%arg0: i32) -> (i32, i32) {
    %c0_i32 = arith.constant 0 : i32
    %c0_i32_0 = arith.constant 0 : i32
    %c0_i32_1 = arith.constant 0 : i32
    return %c0_i32, %c0_i32_0 : i32, i32
  }
  func.func @transform_7(%arg0: i32) -> (i32, i32) {
    %c0_i32 = arith.constant 0 : i32
    %c0_i32_0 = arith.constant 0 : i32
    %c0_i32_1 = arith.constant 0 : i32
    return %c0_i32, %c0_i32_0 : i32, i32
  }
  func.func @transform_8(%arg0: i32) -> (i32, i32) {
    %c0_i32 = arith.constant 0 : i32
    %c0_i32_0 = arith.constant 0 : i32
    return %arg0, %c0_i32 : i32, i32
  }
}

</mosaic_0001>

<bundles_post_ra>
// kernel: tpu_custom_call.1
= control target key start
LH: loop header
LB: loop body
LE: loop exit
PB: predicated region body
PF: predicated region fallthrough
CT: control target
= control target key end

     0   :  { %14 = vsyncpa [#allocation4], 0  ;;  %s1063_s0 = inlined_call_operand.<no memory space> [shape: f32[1,1], index: 0, kind: input, shape index: {}]   ;;  %s1064_s1 = inlined_call_operand.hbm [shape: f32[8,128], index: 1, kind: input, shape index: {}]   ;;  %s1065_s2 = inlined_call_operand.hbm [shape: bf16[128,256], index: 2, kind: input, shape index: {}]   ;;  %s1066_s3 = inlined_call_operand.vmem [shape: f32[1,256], index: 3, kind: input, shape index: {}]   ;;  %s1067_s4 = inlined_call_operand.hbm [shape: bf16[256,256], index: 4, kind: input, shape index: {}]   ;;  %s1068_s5 = inlined_call_operand.vmem [shape: f32[1,256], index: 5, kind: input, shape index: {}]   ;;  %s1069_s6 = inlined_call_operand.hbm [shape: bf16[256,128], index: 6, kind: input, shape index: {}]   ;;  %s1070_s7 = inlined_call_operand.vmem [shape: f32[1,128], index: 7, kind: input, shape index: {}]   ;;  %s1071_s8 = inlined_call_operand.hbm [shape: f32[8,128], index: 8, kind: output, shape index: {}]  }
   0x1   :  { %15 = vsyncpa [#allocation7], 0 }
   0x2   :  { %16 = vsyncpa [#allocation10], 0 }
   0x3   :  { %17 = vsyncpa [#allocation5], 0  ;;  %s981_s27 = smov [#allocation6]  }
   0x4   :  { %s35_s28 = sshll.u32 %s981_s27, 4  ;;  %s36_s28 = int_to_ptr.vmem [resolvable:$true] %s35_s28 }
   0x5   :  { %s881_s29 = scalar_lea.vmem %s36_s28, 2048  ;;  %p886_p1 = scmp.lt.s32.totalorder %s36_s28, %s36_s28 }
   0x6   :  { %p882_p0 = scmp.ne.s32.totalorder %s36_s28, %s881_s29  ;;  %p887_p2 = scmp.lt.s32.totalorder %s881_s29, %s881_s29 }
   0x8   :  { %p888_p3 = por %p887_p2, %p886_p1 }
   0xa   :  { %p889_p4 = pnand %p888_p3, %p882_p0 }
   0xc   :  { %892 = shalt.err (!%p889_p4)
}
   0xd   :  { %s982_s30 = smov 128   ;;  %s983_s9 = smov 8  }
   0xe   :  { %41 = dma.hbm_to_vmem [thread:$0]  %s1065_s2, 2048, %s36_s28, [#allocation7], %s982_s30, %s982_s30, %s983_s9  }
   0xf   :  { %s984_s12 = smov [#allocation3]   ;;  %s985_s14 = smov [#allocation8]  }
  0x10   :  { %s26_s13 = sshll.u32 %s984_s12, 4  ;;  %s49_s15 = sshll.u32 %s985_s14, 4  ;;  %s27_s13 = int_to_ptr.vmem [resolvable:$true] %s26_s13  ;;  %s50_s15 = int_to_ptr.vmem [resolvable:$true] %s49_s15 }
  0x11   :  { %s901_s16 = scalar_lea.vmem %s27_s13, 128  ;;  %p906_p6 = scmp.lt.s32.totalorder %s27_s13, %s27_s13 }
  0x12   :  { %p902_p5 = scmp.ne.s32.totalorder %s27_s13, %s901_s16  ;;  %p907_p7 = scmp.lt.s32.totalorder %s901_s16, %s901_s16 }
  0x14   :  { %p908_p8 = por %p907_p7, %p906_p6 }
  0x16   :  { %p909_p9 = pnand %p908_p8, %p902_p5 }
  0x18   :  { %912 = shalt.err (!%p909_p9)
}
  0x19   :  { %29 = dma.hbm_to_vmem [thread:$0]  %s1064_s1, 128, %s27_s13, [#allocation4]  }
  0x1a   :  { %s921_s19 = scalar_lea.vmem %s50_s15, 4096  ;;  %p926_p11 = scmp.lt.s32.totalorder %s50_s15, %s50_s15 }
  0x1b   :  { %p922_p10 = scmp.ne.s32.totalorder %s50_s15, %s921_s19  ;;  %p927_p12 = scmp.lt.s32.totalorder %s921_s19, %s921_s19 }
  0x1d   :  { %p928_p13 = por %p927_p12, %p926_p11 }
  0x1f   :  { %p929_p0 = pnand %p928_p13, %p922_p10 }
  0x21   :  { %932 = shalt.err (!%p929_p0)
}
  0x22   :  { %55 = dma.hbm_to_vmem [thread:$0]  %s1067_s4, 4096, %s50_s15, [#allocation7], %s982_s30, %s982_s30, %s983_s9  }
  0x23   :  { %s986_s21 = smov [#allocation9]  }
  0x24   :  { %s63_s22 = sshll.u32 %s986_s21, 4  ;;  %s64_s22 = int_to_ptr.vmem [resolvable:$true] %s63_s22 }
  0x25   :  { %s941_s23 = scalar_lea.vmem %s64_s22, 2048  ;;  %p946_p2 = scmp.lt.s32.totalorder %s64_s22, %s64_s22 }
  0x26   :  { %p942_p1 = scmp.ne.s32.totalorder %s64_s22, %s941_s23  ;;  %p947_p3 = scmp.lt.s32.totalorder %s941_s23, %s941_s23 }
  0x28   :  { %p948_p4 = por %p947_p3, %p946_p2 }
  0x2a   :  { %p949_p5 = pnand %p948_p4, %p942_p1 }
  0x2c   :  { %952 = shalt.err (!%p949_p5)
}
  0x2d   :  { %s987_s1 = smov 64   ;;  %s988_s24 = smov 4  }
  0x2e   :  { %69 = dma.hbm_to_vmem [thread:$0]  %s1069_s6, 2048, %s64_s22, [#allocation10], %s987_s1, %s987_s1, %s988_s24  }
  0x2f   :  { %973 = dma.done.wait [#allocation4], 128  }
  0x30   :  { %974 = vsyncadd [#allocation4], 4294967168 }
  0x31   :  { %975 = dma.done.wait [#allocation7], 6144  }
  0x32   :  { %976 = vsyncadd [#allocation7], 4294961152 }
  0x33   :  { %977 = dma.done.wait [#allocation10], 2048  }
  0x34   :  { %978 = vsyncadd [#allocation10], 4294965248  ;;  %v989_v0 = vmov 0   ;;  %v783_v1 = vld [vmem:[#allocation6 + $0x74] ss:$8 sps:$4 sm:$0xff]   ;;  %v859_v55 = vld [vmem:[#allocation9 + $0x68] sm:$0xff]   ;;  %v105_v63 = vlaneseq }
  0x35   :  { %227 = vmatprep.mubr.bf16.mxu0 %v989_v0  ;;  %v785_v2 = vld [vmem:[#allocation6 + $0x70] ss:$8 sps:$4 sm:$0xff]   ;;  %195 = vmatprep.subr.bf16.mxu0 %v783_v1  ;;  %v786_v3 = vld [vmem:[#allocation6 + $0x64] ss:$8 sps:$4 sm:$0xff]   ;;  %v788_v4 = vld [vmem:[#allocation6 + $0x60] ss:$8 sps:$4 sm:$0xff]  }
  0x36   :  { %196 = vmatpush1.bf16.msra.mxu0 %v785_v2  ;;  %v789_v5 = vld [vmem:[#allocation6 + $0x54] ss:$8 sps:$4 sm:$0xff]   ;;  %v791_v6 = vld [vmem:[#allocation6 + $0x50] ss:$8 sps:$4 sm:$0xff]   ;;  %v792_v7 = vld [vmem:[#allocation6 + $0x44] ss:$8 sps:$4 sm:$0xff]  }
  0x37   :  { %197 = vmatprep.subr.bf16.mxu0 %v786_v3  ;;  %v794_v8 = vld [vmem:[#allocation6 + $0x40] ss:$8 sps:$4 sm:$0xff]   ;;  %v795_v9 = vld [vmem:[#allocation6 + $0x34] ss:$8 sps:$4 sm:$0xff]   ;;  %v809_v11 = vld [vmem:[#allocation8 + $0x70] ss:$8 sps:$4 sm:$0xff]  }
  0x38   :  { %v807_v10 = vld [vmem:[#allocation8 + $0x74] ss:$8 sps:$4 sm:$0xff]   ;;  %v810_v12 = vld [vmem:[#allocation8 + $0x64] ss:$8 sps:$4 sm:$0xff]   ;;  %v797_v13 = vld [vmem:[#allocation6 + $0x30] ss:$8 sps:$4 sm:$0xff]  }
  0x39   :  { %444 = vmatprep.subr.bf16.mxu1 %v807_v10  ;;  %v812_v14 = vld [vmem:[#allocation8 + $0x60] ss:$8 sps:$4 sm:$0xff]   ;;  %v813_v15 = vld [vmem:[#allocation8 + $0x54] ss:$8 sps:$4 sm:$0xff]   ;;  %v798_v16 = vld [vmem:[#allocation6 + $0x24] ss:$8 sps:$4 sm:$0xff]  }
  0x3a   :  { %198 = vmatpush1.bf16.msra.mxu0 %v788_v4  ;;  %445 = vmatpush1.bf16.msra.mxu1 %v809_v11  ;;  %v800_v17 = vld [vmem:[#allocation6 + $0x20] ss:$8 sps:$4 sm:$0xff]   ;;  %v815_v18 = vld [vmem:[#allocation8 + $0x50] ss:$8 sps:$4 sm:$0xff]   ;;  %v816_v19 = vld [vmem:[#allocation8 + $0x44] ss:$8 sps:$4 sm:$0xff]  }
  0x3b   :  { %199 = vmatprep.subr.bf16.mxu0 %v789_v5  ;;  %446 = vmatprep.subr.bf16.mxu1 %v810_v12  ;;  %v801_v20 = vld [vmem:[#allocation6 + $0x14] ss:$8 sps:$4 sm:$0xff]   ;;  %v803_v21 = vld [vmem:[#allocation6 + $0x10] ss:$8 sps:$4 sm:$0xff]   ;;  %v818_v22 = vld [vmem:[#allocation8 + $0x40] ss:$8 sps:$4 sm:$0xff]  }
  0x3c   :  { %v819_v23 = vld [vmem:[#allocation8 + $0x34] ss:$8 sps:$4 sm:$0xff]   ;;  %v804_v24 = vld [vmem:[#allocation6 + $0x4] ss:$8 sps:$4 sm:$0xff]   ;;  %v806_v25 = vld [vmem:[#allocation6] ss:$8 sps:$4 sm:$0xff]  }
  0x3d   :  { %v85_v26 = vld [vmem:[#allocation3] sm:$0xff]  ;;  %v822_v28 = vld [vmem:[#allocation8 + $0x24] ss:$8 sps:$4 sm:$0xff]   ;;  %v824_v29 = vld [vmem:[#allocation8 + $0x20] ss:$8 sps:$4 sm:$0xff]   ;;  %v106_v0 = vshrl.u32 %v105_v63, 7 }
  0x3e   :  { %200 = vmatpush1.bf16.msra.mxu0 %v791_v6  ;;  %447 = vmatpush1.bf16.msra.mxu1 %v812_v14  ;;  %v821_v27 = vld [vmem:[#allocation8 + $0x30] ss:$8 sps:$4 sm:$0xff]   ;;  %v825_v30 = vld [vmem:[#allocation8 + $0x14] ss:$8 sps:$4 sm:$0xff]   ;;  %v86_v31 = vpack.c.bf16 %v85_v26, %v85_v26  ;;  %v828_v33 = vld [vmem:[#allocation8 + $0x4] ss:$8 sps:$4 sm:$0xff]  }
  0x3f   :  { %201 = vmatprep.subr.bf16.mxu0 %v792_v7  ;;  %448 = vmatprep.subr.bf16.mxu1 %v813_v15  ;;  %v827_v32 = vld [vmem:[#allocation8 + $0x10] ss:$8 sps:$4 sm:$0xff]   ;;  %v830_v34 = vld [vmem:[#allocation8] ss:$8 sps:$4 sm:$0xff]   ;;  %v831_v35 = vld [vmem:[#allocation8 + $0xf4] ss:$8 sps:$4 sm:$0xff]  }
  0x40   :  { %v833_v36 = vld [vmem:[#allocation8 + $0xf0] ss:$8 sps:$4 sm:$0xff]   ;;  %v834_v37 = vld [vmem:[#allocation8 + $0xe4] ss:$8 sps:$4 sm:$0xff]   ;;  %v836_v38 = vld [vmem:[#allocation8 + $0xe0] ss:$8 sps:$4 sm:$0xff]  }
  0x41   :  { %v837_v39 = vld [vmem:[#allocation8 + $0xd4] ss:$8 sps:$4 sm:$0xff]   ;;  %v839_v40 = vld [vmem:[#allocation8 + $0xd0] ss:$8 sps:$4 sm:$0xff]   ;;  %v840_v41 = vld [vmem:[#allocation8 + $0xc4] ss:$8 sps:$4 sm:$0xff]  }
  0x42   :  { %202 = vmatpush1.bf16.msra.mxu0 %v794_v8  ;;  %449 = vmatpush1.bf16.msra.mxu1 %v815_v18  ;;  %v842_v42 = vld [vmem:[#allocation8 + $0xc0] ss:$8 sps:$4 sm:$0xff]   ;;  %v843_v43 = vld [vmem:[#allocation8 + $0xb4] ss:$8 sps:$4 sm:$0xff]   ;;  %v845_v44 = vld [vmem:[#allocation8 + $0xb0] ss:$8 sps:$4 sm:$0xff]  }
  0x43   :  { %203 = vmatprep.subr.bf16.mxu0 %v795_v9  ;;  %450 = vmatprep.subr.bf16.mxu1 %v816_v19  ;;  %v846_v45 = vld [vmem:[#allocation8 + $0xa4] ss:$8 sps:$4 sm:$0xff]   ;;  %v848_v46 = vld [vmem:[#allocation8 + $0xa0] ss:$8 sps:$4 sm:$0xff]   ;;  %v849_v47 = vld [vmem:[#allocation8 + $0x94] ss:$8 sps:$4 sm:$0xff]  }
  0x44   :  { %v851_v48 = vld [vmem:[#allocation8 + $0x90] ss:$8 sps:$4 sm:$0xff]   ;;  %v852_v49 = vld [vmem:[#allocation8 + $0x84] ss:$8 sps:$4 sm:$0xff]   ;;  %v854_v50 = vld [vmem:[#allocation8 + $0x80] ss:$8 sps:$4 sm:$0xff]  }
  0x45   :  { %v855_v51 = vld [vmem:[#allocation9 + $0x78] sm:$0xff]   ;;  %v857_v53 = vld [vmem:[#allocation9 + $0x70] sm:$0xff]   ;;  %v860_v56 = vld [vmem:[#allocation9 + $0x28] sm:$0xff]   ;;  %v107_v1 = vsub.s32 0, %v106_v0  ;;  %v111_v3 = vsub.s32 1, %v106_v0  ;;  %s990_s9 = smov [#allocation11]  }
  0x46   :  { %204 = vmatpush1.bf16.msra.mxu0 %v797_v13  ;;  %451 = vmatpush1.bf16.msra.mxu1 %v818_v22  ;;  %v856_v52 = vld [vmem:[#allocation9 + $0x38] sm:$0xff]   ;;  %v858_v54 = vld [vmem:[#allocation9 + $0x30] sm:$0xff]   ;;  %v861_v57 = vld [vmem:[#allocation9 + $0x60] sm:$0xff]   ;;  %s675_s10 = sshll.u32 %s990_s9, 4  ;;  %s676_s10 = int_to_ptr.vmem [resolvable:$true] %s675_s10 }
  0x47   :  { %205 = vmatprep.subr.bf16.mxu0 %v798_v16  ;;  %452 = vmatprep.subr.bf16.mxu1 %v819_v23  ;;  %v862_v58 = vld [vmem:[#allocation9 + $0x20] sm:$0xff]   ;;  %v863_v59 = vld [vmem:[#allocation9 + $0x58] sm:$0xff]   ;;  %v865_v61 = vld [vmem:[#allocation9 + $0x50] sm:$0xff]   ;;  %s953_s11 = scalar_lea.vmem %s676_s10, 128  ;;  %p958_p7 = scmp.lt.s32.totalorder %s676_s10, %s676_s10 }
  0x48   :  { %v864_v60 = vld [vmem:[#allocation9 + $0x18] sm:$0xff]   ;;  %v866_v62 = vld [vmem:[#allocation9 + $0x10] sm:$0xff]   ;;  %v867_v16 = vld [vmem:[#allocation9 + $0x48] sm:$0xff]   ;;  %p954_p6 = scmp.ne.s32.totalorder %s676_s10, %s953_s11  ;;  %p959_p8 = scmp.lt.s32.totalorder %s953_s11, %s953_s11 }
  0x49   :  { %v103_v2 = vld [vmem:[%s1066_s3] sm:$0x3]  ;;  %v869_v18 = vld [vmem:[#allocation9 + $0x40] sm:$0xff]  }
  0x4a   :  { %206 = vmatpush1.bf16.msra.mxu0 %v800_v17  ;;  %453 = vmatpush1.bf16.msra.mxu1 %v821_v27  ;;  %v108_v4 = vrot.slane %v103_v2, %v107_v1  ;;  %v112_v5 = vrot.slane %v103_v2, %v111_v3  ;;  %v868_v17 = vld [vmem:[#allocation9 + $0x8] sm:$0xff]   ;;  %v870_v19 = vld [vmem:[#allocation9] sm:$0xff]   ;;  %p960_p9 = por %p959_p8, %p958_p7 }
  0x4b   :  { %207 = vmatprep.subr.bf16.mxu0 %v801_v20  ;;  %454 = vmatprep.subr.bf16.mxu1 %v822_v28  ;;  %v272_v20 = vld [vmem:[%s1068_s5] sm:$0x3] }
  0x4c   :  { %v281_v22 = vrot.slane %v272_v20, %v111_v3  ;;  %p961_p10 = pnand %p960_p9, %p954_p6 }
  0x4e   :  { %208 = vmatpush1.bf16.msra.mxu0 %v803_v21  ;;  %455 = vmatpush1.bf16.msra.mxu1 %v824_v29  ;;  %v277_v21 = vrot.slane %v272_v20, %v107_v1 }
  0x4f   :  { %209 = vmatprep.subr.bf16.mxu0 %v804_v24  ;;  %456 = vmatprep.subr.bf16.mxu1 %v825_v30 }
  0x52   :  { %210 = vmatpush1.bf16.msra.mxu0 %v806_v25  ;;  %457 = vmatpush1.bf16.msra.mxu1 %v827_v32 }
  0x53   :  { %458 = vmatprep.subr.bf16.mxu1 %v828_v33  ;;  %751 = vmatprep.subr.bf16.mxu0 %v855_v51 }
  0x55   :  { %228 = vmatmul.mubr.bf16.vlgmr.msra.gmra.mxu0 %v86_v31 }
  0x56   :  { %459 = vmatpush1.bf16.msra.mxu1 %v830_v34  ;;  %752 = vmatpush3.bf16.msra.mxu0 %v856_v52  ;;  %v734_v34 = vld [vmem:[%s1070_s7] ss:$0 sm:$0xff] }
  0x57   :  { %460 = vmatprep.subr.bf16.mxu1 %v831_v35  ;;  %753 = vmatprep.subr.bf16.mxu0 %v857_v53 }
  0x5a   :  { %461 = vmatpush2.bf16.msra.mxu1 %v833_v36  ;;  %754 = vmatpush3.bf16.msra.mxu0 %v858_v54 }
  0x5b   :  { %462 = vmatprep.subr.bf16.mxu1 %v834_v37  ;;  %755 = vmatprep.subr.bf16.mxu0 %v859_v55 }
  0x5e   :  { %463 = vmatpush2.bf16.msra.mxu1 %v836_v38  ;;  %756 = vmatpush3.bf16.msra.mxu0 %v860_v56 }
  0x5f   :  { %464 = vmatprep.subr.bf16.mxu1 %v837_v39  ;;  %757 = vmatprep.subr.bf16.mxu0 %v861_v57 }
  0x62   :  { %465 = vmatpush2.bf16.msra.mxu1 %v839_v40  ;;  %758 = vmatpush3.bf16.msra.mxu0 %v862_v58  ;;  %v666_v40 = vstv %s1063_s0 }
  0x63   :  { %466 = vmatprep.subr.bf16.mxu1 %v840_v41  ;;  %759 = vmatprep.subr.bf16.mxu0 %v863_v59 }
  0x66   :  { %467 = vmatpush2.bf16.msra.mxu1 %v842_v42  ;;  %760 = vmatpush3.bf16.msra.mxu0 %v864_v60 }
  0x67   :  { %468 = vmatprep.subr.bf16.mxu1 %v843_v43  ;;  %761 = vmatprep.subr.bf16.mxu0 %v865_v61 }
  0x6a   :  { %469 = vmatpush2.bf16.msra.mxu1 %v845_v44  ;;  %762 = vmatpush3.bf16.msra.mxu0 %v866_v62 }
  0x6b   :  { %470 = vmatprep.subr.bf16.mxu1 %v846_v45  ;;  %763 = vmatprep.subr.bf16.mxu0 %v867_v16 }
  0x6e   :  { %471 = vmatpush2.bf16.msra.mxu1 %v848_v46  ;;  %764 = vmatpush3.bf16.msra.mxu0 %v868_v17 }
  0x6f   :  { %472 = vmatprep.subr.bf16.mxu1 %v849_v47  ;;  %765 = vmatprep.subr.bf16.mxu0 %v869_v18 }
  0x72   :  { %473 = vmatpush2.bf16.msra.mxu1 %v851_v48  ;;  %766 = vmatpush3.bf16.msra.mxu0 %v870_v19 }
  0x73   :  { %474 = vmatprep.subr.bf16.mxu1 %v852_v49 }
  0x76   :  { %475 = vmatpush2.bf16.msra.mxu1 %v854_v50 }
 0x115   :  { %v229_v6 = vpop.f32.mrf.mxu0 }
 0x116   :  { %v230_v7 = vadd.f32 %v229_v6, %v108_v4 }
 0x117   :  { %v231_v8 = vpop.f32.mrf.mxu0 }
 0x118   :  { %v232_v9 = vadd.f32 %v231_v8, %v112_v5  ;;  %v236_v10 = vmax.f32 %v230_v7, 0.0 }
 0x119   :  { %v233_v11 = vpop.f32.mrf.mxu0 }
 0x11a   :  { %v237_v12 = vmax.f32 %v232_v9, 0.0  ;;  %v238_v15 = vpack.c.bf16 %v236_v10, %v236_v10 }
 0x11b   :  { %v234_v13 = vpop.f32.mrf.mxu0 }
 0x11c   :  { %v239_v14 = vpack.c.bf16 %v237_v12, %v237_v12 }
 0x11e   :  { %476 = vmatprep.mubr.bf16.mxu1 %v239_v14 }
 0x11f   :  { %477 = vmatmul.mubr.bf16.vlgmr.msra.gmra.mxu1 %v238_v15 }
 0x1df   :  { %v478_v23 = vpop.f32.mrf.mxu1 }
 0x1e0   :  { %v479_v24 = vadd.f32 %v478_v23, %v277_v21 }
 0x1e1   :  { %v480_v25 = vpop.f32.mrf.mxu1 }
 0x1e2   :  { %v481_v26 = vadd.f32 %v480_v25, %v281_v22  ;;  %v485_v27 = vmax.f32 %v479_v24, 0.0 }
 0x1e3   :  { %v482_v28 = vpop.f32.mrf.mxu1 }
 0x1e4   :  { %v486_v29 = vmax.f32 %v481_v26, 0.0  ;;  %v487_v32 = vpack.c.bf16 %v485_v27, %v485_v27 }
 0x1e5   :  { %v483_v30 = vpop.f32.mrf.mxu1 }
 0x1e6   :  { %v488_v31 = vpack.c.bf16 %v486_v29, %v486_v29 }
 0x1e8   :  { %656 = vmatprep.mubr.bf16.mxu0 %v488_v31 }
 0x1e9   :  { %657 = vmatmul.mubr.bf16.vlgmr.msra.gmra.mxu0 %v487_v32 }
 0x2a9   :  { %v767_v33 = vpop.f32.mrf.mxu0 }
 0x2ab   :  { %v768_v35 = vpop.f32.mrf.mxu0 }
 0x2ac   :  { %v769_v36 = vadd.f32 %v768_v35, %v767_v33 }
 0x2ad   :  { %v770_v37 = vpop.f32.mrf.mxu0 }
 0x2ae   :  { %v659_v38 = vadd.f32 %v769_v36, %v734_v34 }
 0x2af   :  { %v771_v39 = vpop.f32.mrf.mxu0 }
 0x2b0   :  { %871 = vtanh.f32 %v659_v38 }
 0x2bd   :  { %v872_v41 = vpop.eup %871 }
 0x2be   :  { %v667_v42 = vmul.f32 %v872_v41, %v666_v40 }
 0x2c0   :  { %668 = vst [vmem:[#allocation11] sm:$0xff] %v667_v42 }
 0x2c1   :  { %964 = shalt.err (!%p961_p10)
}
 0x2c2   :  { %678 = dma.vmem_to_hbm [thread:$0]  %s676_s10, 128, %s1071_s8, [#allocation5]  }
 0x2c3   :  { %979 = dma.done.wait [#allocation5], 128  }
 0x2c4   :  { %980 = vsyncadd [#allocation5], 4294967168 }
 0x2c5   :  { %682 = vsyncpa [#allocation4], 1 }
 0x2c6   :  { %683 = vsyncpa [#allocation7], 1 }
 0x2c7   :  { %684 = vsyncpa [#allocation10], 1 }
 0x2c8   :  { %685 = vsyncpa [#allocation5], 1 }

</bundles_post_ra>
